<compile_context>
chip_gen: v7x
topology: tpu7x:2x2x1
jax: 0.10.0
libtpu: 0.0.40
codegen_flags: <defaults>
</compile_context>

<pallas_src>
import functools

import jax
import jax.numpy as jnp
from jax.experimental import pallas as pl
from jax.experimental.pallas import tpu as pltpu

LANE = 128
SUBLANE = 8


def _round_up(n, m):
    return (n + m - 1) // m * m


def pnn_kernel(x_ref,
               w0_ref, b0_ref,
               w1_ref, b1_ref,
               w2_ref, b2_ref,
               out_ref,
               *, out_dim):
    """One batch tile of the 3-layer MLP. Weights are VMEM-resident bf16."""
    # layer 0: Linear + ReLU (bf16 matmul, f32 accumulate + epilogue).
    # x arrives as f32 and is cast here (avoids a padded bf16 copy in HBM).
    h = jnp.dot(x_ref[...].astype(jnp.bfloat16), w0_ref[...],
                preferred_element_type=jnp.float32)
    h = jnp.maximum(h + b0_ref[...], 0.0)

    # layer 1: Linear + ReLU
    h = jnp.dot(h.astype(jnp.bfloat16), w1_ref[...],
                preferred_element_type=jnp.float32)
    h = jnp.maximum(h + b1_ref[...], 0.0)

    # layer 2 (final, width = 2*output_dim padded): Linear + ReLU
    h = jnp.dot(h.astype(jnp.bfloat16), w2_ref[...],
                preferred_element_type=jnp.float32)
    h = jnp.maximum(h + b2_ref[...], 0.0)

    # Single lane-dense store: mu columns pass through, std columns get
    # softplus(.) + 1e-6. h >= 0 post-ReLU, so softplus(h) = h + log1p(exp(-h))
    # is exact and needs no threshold clamp (matches PyTorch F.softplus here).
    col = jax.lax.broadcasted_iota(jnp.int32, h.shape, dimension=1)
    sp = h + jnp.log1p(jnp.exp(-h))
    out_ref[...] = jnp.where(col < out_dim, h, sp + 1e-6)


def pack_pnn_params(params):
    """Pad feature dims to multiples of 128 lanes and cast weights to bf16.

    Done ONCE outside the per-call jit (hoists the pad/cast kernels off the
    forward path). W0 keeps its unpadded row count; padded hidden columns are
    zero (zero weights + zero bias -> relu -> 0), so results are unchanged.
    """
    (w0, b0), (w1, b1), (w2, b2) = params
    in_dim = w0.shape[0]
    d1_p = _round_up(w0.shape[1], LANE)
    d2_p = _round_up(w1.shape[1], LANE)
    d3_p = _round_up(w2.shape[1], LANE)

    def pad_w(w, rows, cols):
        out = jnp.zeros((rows, cols), jnp.bfloat16)
        return out.at[:w.shape[0], :w.shape[1]].set(w.astype(jnp.bfloat16))

    def pad_b(b, cols):
        out = jnp.zeros((1, cols), jnp.float32)
        return out.at[0, :b.shape[0]].set(b.astype(jnp.float32))

    return (pad_w(w0, in_dim, d1_p), pad_b(b0, d1_p),
            pad_w(w1, d1_p, d2_p), pad_b(b1, d2_p),
            pad_w(w2, d2_p, d3_p), pad_b(b2, d3_p))


@functools.partial(jax.jit, static_argnames=("output_dim", "block_batch"))
def pnn_forward(x, packed, output_dim, block_batch=1024):
    """packed = pack_pnn_params(params). Returns (mu, std)."""
    w0_p, b0_p, w1_p, b1_p, w2_p, b2_p = packed
    batch, in_dim = x.shape
    d1_p = w0_p.shape[1]
    d2_p = w1_p.shape[1]
    d3_p = w2_p.shape[1]

    # Pad the batch only when it isn't sublane-aligned (rows are independent;
    # padded rows are sliced off below).
    batch_p = _round_up(batch, SUBLANE)
    if batch_p != batch:
        x = jnp.pad(x, ((0, batch_p - batch), (0, 0)))

    # Batch tile: big enough to amortize the ~0.35 us per-step overhead, small
    # enough to give >= 2 grid steps when the batch allows it (so v7x can
    # shard the "parallel" axis across both TensorCores; on v5e/v6e the extra
    # step is negligible). VMEM at TB=1024: ~1.5 MiB pipelined activations +
    # ~75 KiB resident weights, far under the 32 MiB scoped default.
    tb = min(block_batch, batch_p)
    if pl.cdiv(batch_p, tb) < 2 and batch_p >= 2 * SUBLANE:
        tb = _round_up(pl.cdiv(batch_p, 2), SUBLANE)

    act_spec = lambda feat: pl.BlockSpec((tb, feat), lambda i: (i, 0))
    resident = lambda shape: pl.BlockSpec(shape, lambda i: (0, 0))

    out = pl.pallas_call(
        functools.partial(pnn_kernel, out_dim=output_dim),
        out_shape=jax.ShapeDtypeStruct((batch_p, d3_p), jnp.float32),
        grid=(pl.cdiv(batch_p, tb),),
        in_specs=[
            act_spec(in_dim),               # x tile (pipelined, f32, unpadded lanes)
            resident((in_dim, d1_p)),       # W0 (VMEM-resident, bf16)
            resident((1, d1_p)),            # b0 (f32)
            resident((d1_p, d2_p)),         # W1
            resident((1, d2_p)),            # b1
            resident((d2_p, d3_p)),         # W2
            resident((1, d3_p)),            # b2
        ],
        out_specs=act_spec(d3_p),
        compiler_params=pltpu.CompilerParams(
            dimension_semantics=("parallel",)),
    )(x, w0_p, b0_p, w1_p, b1_p, w2_p, b2_p)

    # Module semantics require two arrays; fuse this split into the consumer
    # (or keep the packed block) in a real pipeline to avoid the extra pass.
    mu = out[:batch, :output_dim]
    std = out[:batch, output_dim:2 * output_dim]
    return mu, std


def init_pnn_params(key, input_dim, hidden_dim, output_dim):
    """PyTorch-style Linear init (uniform +/- 1/sqrt(fan_in)).

    Weights are returned already transposed to (in_features, out_features).
    """
    layer_dim = [input_dim] + list(hidden_dim) + [output_dim * 2]
    params = []
    for i in range(len(layer_dim) - 1):
        fan_in, fan_out = layer_dim[i], layer_dim[i + 1]
        key, kw, kb = jax.random.split(key, 3)
        bound = 1.0 / (fan_in ** 0.5)
        w = jax.random.uniform(kw, (fan_in, fan_out), jnp.float32, -bound, bound)
        b = jax.random.uniform(kb, (fan_out,), jnp.float32, -bound, bound)
        params.append((w, b))
    return params


def _softplus_ref(x):
    # Matches PyTorch F.softplus (beta=1, threshold=20).
    return jnp.where(x > 20.0, x, jnp.log1p(jnp.exp(jnp.minimum(x, 20.0))))


def pnn_reference(x, params, bf16_matmul=False):
    """Pure-JAX reference mirroring the PyTorch forward."""
    h = x
    for w, b in params:
        if bf16_matmul:
            hm = jnp.dot(h.astype(jnp.bfloat16), w.astype(jnp.bfloat16),
                         preferred_element_type=jnp.float32)
        else:
            hm = h @ w
        h = jnp.maximum(hm + b, 0.0)
    out_dim = h.shape[-1] // 2
    mu, std = h[:, :out_dim], h[:, out_dim:]
    std = _softplus_ref(std) + 1e-6
    return mu, std


if __name__ == "__main__":
    # Small deterministic example: batch=8, input_dim=32, hidden=[128,128],
    # output_dim=64. NOTE: at batch=8 the call is launch/DMA-latency bound;
    # batch many heads / timesteps into one call for real utilization.
    input_dim, hidden_dim, output_dim = 32, [128, 128], 64
    batch = 8

    key = jax.random.PRNGKey(0)
    key, kx = jax.random.split(key)
    x = jax.random.normal(kx, (batch, input_dim), jnp.float32)
    params = init_pnn_params(key, input_dim, hidden_dim, output_dim)

    packed = pack_pnn_params(params)          # one-time weight pack (off the hot path)
    mu, std = pnn_forward(x, packed, output_dim)
    jax.block_until_ready((mu, std))

    # Tight check against a bf16-matmul / f32-accumulate reference (same math
    # as the kernel), loose check against the pure-fp32 PyTorch-equivalent.
    mu_bf, std_bf = pnn_reference(x, params, bf16_matmul=True)
    mu_f32, std_f32 = pnn_reference(x, params, bf16_matmul=False)

    assert mu.shape == (batch, output_dim) and std.shape == (batch, output_dim)
    assert jnp.allclose(mu, mu_bf, atol=2e-3, rtol=2e-3)
    assert jnp.allclose(std, std_bf, atol=2e-3, rtol=2e-3)
    assert jnp.allclose(mu, mu_f32, atol=5e-2, rtol=5e-2)
    assert jnp.allclose(std, std_f32, atol=5e-2, rtol=5e-2)
    assert bool(jnp.all(std > 0.0))

    print("KERNEL_OK")
</pallas_src>

<mosaic_0001>
module attributes {stable_mosaic.version = 11 : i64} {
  func.func @pnn_kernel(%arg0: i32, %arg1: memref<8x32xf32, #tpu.memory_space<vmem>>, %arg2: memref<32x128xbf16, #tpu.memory_space<vmem>>, %arg3: memref<1x128xf32, #tpu.memory_space<vmem>>, %arg4: memref<128x128xbf16, #tpu.memory_space<vmem>>, %arg5: memref<1x128xf32, #tpu.memory_space<vmem>>, %arg6: memref<128x128xbf16, #tpu.memory_space<vmem>>, %arg7: memref<1x128xf32, #tpu.memory_space<vmem>>, %arg8: memref<8x128xf32, #tpu.memory_space<vmem>>) attributes {dimension_semantics = [#tpu.dimension_semantics<parallel>], iteration_bounds = array<i64: 1>, scalar_prefetch = 0 : i64, scratch_operands = 0 : i64, tpu.core_type = #tpu.core_type<tc>, window_params = [{transform_indices = @transform_0, window_bounds = array<i64: 8, 32>}, {pipeline_mode = #tpu.pipeline_mode<synchronous>, transform_indices = @transform_1, window_bounds = array<i64: 32, 128>}, {pipeline_mode = #tpu.pipeline_mode<synchronous>, transform_indices = @transform_2, window_bounds = array<i64: 1, 128>}, {pipeline_mode = #tpu.pipeline_mode<synchronous>, transform_indices = @transform_3, window_bounds = array<i64: 128, 128>}, {pipeline_mode = #tpu.pipeline_mode<synchronous>, transform_indices = @transform_4, window_bounds = array<i64: 1, 128>}, {pipeline_mode = #tpu.pipeline_mode<synchronous>, transform_indices = @transform_5, window_bounds = array<i64: 128, 128>}, {pipeline_mode = #tpu.pipeline_mode<synchronous>, transform_indices = @transform_6, window_bounds = array<i64: 1, 128>}, {transform_indices = @transform_7, window_bounds = array<i64: 8, 128>}]} {
    %c0 = arith.constant 0 : index
    %c0_0 = arith.constant 0 : index
    %0 = vector.load %arg1[%c0, %c0_0] : memref<8x32xf32, #tpu.memory_space<vmem>>, vector<8x32xf32>
    %1 = arith.truncf %0 : vector<8x32xf32> to vector<8x32xbf16>
    %c0_1 = arith.constant 0 : index
    %c0_2 = arith.constant 0 : index
    %2 = vector.load %arg2[%c0_1, %c0_2] : memref<32x128xbf16, #tpu.memory_space<vmem>>, vector<32x128xbf16>
    %cst = arith.constant dense<0.000000e+00> : vector<8x128xf32>
    %3 = tpu.matmul %1, %2, %cst {dimension_numbers = #tpu.dot_dimension_numbers<[1], [0], [0], [1], [0, 0, 1, 1], [], []>} : vector<8x32xbf16>, vector<32x128xbf16>, vector<8x128xf32> -> vector<8x128xf32>
    %c0_3 = arith.constant 0 : index
    %c0_4 = arith.constant 0 : index
    %4 = vector.load %arg3[%c0_3, %c0_4] : memref<1x128xf32, #tpu.memory_space<vmem>>, vector<1x128xf32>
    %5 = vector.broadcast %4 : vector<1x128xf32> to vector<8x128xf32>
    %6 = arith.addf %3, %5 : vector<8x128xf32>
    %cst_5 = arith.constant 0.000000e+00 : f32
    %7 = vector.broadcast %cst_5 : f32 to vector<8x128xf32>
    %8 = arith.maximumf %6, %7 : vector<8x128xf32>
    %9 = arith.truncf %8 : vector<8x128xf32> to vector<8x128xbf16>
    %c0_6 = arith.constant 0 : index
    %c0_7 = arith.constant 0 : index
    %10 = vector.load %arg4[%c0_6, %c0_7] : memref<128x128xbf16, #tpu.memory_space<vmem>>, vector<128x128xbf16>
    %cst_8 = arith.constant dense<0.000000e+00> : vector<8x128xf32>
    %11 = tpu.matmul %9, %10, %cst_8 {dimension_numbers = #tpu.dot_dimension_numbers<[1], [0], [0], [1], [0, 0, 1, 1], [], []>} : vector<8x128xbf16>, vector<128x128xbf16>, vector<8x128xf32> -> vector<8x128xf32>
    %c0_9 = arith.constant 0 : index
    %c0_10 = arith.constant 0 : index
    %12 = vector.load %arg5[%c0_9, %c0_10] : memref<1x128xf32, #tpu.memory_space<vmem>>, vector<1x128xf32>
    %13 = vector.broadcast %12 : vector<1x128xf32> to vector<8x128xf32>
    %14 = arith.addf %11, %13 : vector<8x128xf32>
    %cst_11 = arith.constant 0.000000e+00 : f32
    %15 = vector.broadcast %cst_11 : f32 to vector<8x128xf32>
    %16 = arith.maximumf %14, %15 : vector<8x128xf32>
    %17 = arith.truncf %16 : vector<8x128xf32> to vector<8x128xbf16>
    %c0_12 = arith.constant 0 : index
    %c0_13 = arith.constant 0 : index
    %18 = vector.load %arg6[%c0_12, %c0_13] : memref<128x128xbf16, #tpu.memory_space<vmem>>, vector<128x128xbf16>
    %cst_14 = arith.constant dense<0.000000e+00> : vector<8x128xf32>
    %19 = tpu.matmul %17, %18, %cst_14 {dimension_numbers = #tpu.dot_dimension_numbers<[1], [0], [0], [1], [0, 0, 1, 1], [], []>} : vector<8x128xbf16>, vector<128x128xbf16>, vector<8x128xf32> -> vector<8x128xf32>
    %c0_15 = arith.constant 0 : index
    %c0_16 = arith.constant 0 : index
    %20 = vector.load %arg7[%c0_15, %c0_16] : memref<1x128xf32, #tpu.memory_space<vmem>>, vector<1x128xf32>
    %21 = vector.broadcast %20 : vector<1x128xf32> to vector<8x128xf32>
    %22 = arith.addf %19, %21 : vector<8x128xf32>
    %cst_17 = arith.constant 0.000000e+00 : f32
    %23 = vector.broadcast %cst_17 : f32 to vector<8x128xf32>
    %24 = arith.maximumf %22, %23 : vector<8x128xf32>
    %25 = tpu.iota {dimensions = array<i32: 1>} : vector<8x128xi32>
    %cst_18 = arith.constant 0.000000e+00 : f32
    %26 = vector.broadcast %cst_18 : f32 to vector<8x128xf32>
    %27 = arith.subf %26, %24 : vector<8x128xf32>
    %28 = math.exp %27 : vector<8x128xf32>
    %29 = math.log1p %28 : vector<8x128xf32>
    %30 = arith.addf %24, %29 : vector<8x128xf32>
    %c64_i32 = arith.constant 64 : i32
    %31 = vector.broadcast %c64_i32 : i32 to vector<8x128xi32>
    %32 = arith.cmpi slt, %25, %31 : vector<8x128xi32>
    %cst_19 = arith.constant 9.99999997E-7 : f32
    %33 = vector.broadcast %cst_19 : f32 to vector<8x128xf32>
    %34 = arith.addf %30, %33 : vector<8x128xf32>
    %35 = arith.select %32, %24, %34 : vector<8x128xi1>, vector<8x128xf32>
    %c0_20 = arith.constant 0 : index
    %c0_21 = arith.constant 0 : index
    %36 = vector.load %arg8[%c0_20, %c0_21] : memref<8x128xf32, #tpu.memory_space<vmem>>, vector<8x128xf32>
    tpu.vector_store %arg8[%c0_20, %c0_21], %35 {strides = array<i32>} : memref<8x128xf32, #tpu.memory_space<vmem>>, vector<8x128xf32>,
    return
  }
  func.func @transform_0(%arg0: i32) -> (i32, i32) {
    %c0_i32 = arith.constant 0 : i32
    %c0_i32_0 = arith.constant 0 : i32
    return %arg0, %c0_i32 : i32, i32
  }
  func.func @transform_1(%arg0: i32) -> (i32, i32) {
    %c0_i32 = arith.constant 0 : i32
    %c0_i32_0 = arith.constant 0 : i32
    %c0_i32_1 = arith.constant 0 : i32
    return %c0_i32, %c0_i32_0 : i32, i32
  }
  func.func @transform_2(%arg0: i32) -> (i32, i32) {
    %c0_i32 = arith.constant 0 : i32
    %c0_i32_0 = arith.constant 0 : i32
    %c0_i32_1 = arith.constant 0 : i32
    return %c0_i32, %c0_i32_0 : i32, i32
  }
  func.func @transform_3(%arg0: i32) -> (i32, i32) {
    %c0_i32 = arith.constant 0 : i32
    %c0_i32_0 = arith.constant 0 : i32
    %c0_i32_1 = arith.constant 0 : i32
    return %c0_i32, %c0_i32_0 : i32, i32
  }
  func.func @transform_4(%arg0: i32) -> (i32, i32) {
    %c0_i32 = arith.constant 0 : i32
    %c0_i32_0 = arith.constant 0 : i32
    %c0_i32_1 = arith.constant 0 : i32
    return %c0_i32, %c0_i32_0 : i32, i32
  }
  func.func @transform_5(%arg0: i32) -> (i32, i32) {
    %c0_i32 = arith.constant 0 : i32
    %c0_i32_0 = arith.constant 0 : i32
    %c0_i32_1 = arith.constant 0 : i32
    return %c0_i32, %c0_i32_0 : i32, i32
  }
  func.func @transform_6(%arg0: i32) -> (i32, i32) {
    %c0_i32 = arith.constant 0 : i32
    %c0_i32_0 = arith.constant 0 : i32
    %c0_i32_1 = arith.constant 0 : i32
    return %c0_i32, %c0_i32_0 : i32, i32
  }
  func.func @transform_7(%arg0: i32) -> (i32, i32) {
    %c0_i32 = arith.constant 0 : i32
    %c0_i32_0 = arith.constant 0 : i32
    return %arg0, %c0_i32 : i32, i32
  }
}

</mosaic_0001>

<bundles_post_ra>
// kernel: pnn_forward.1
= control target key start
LH: loop header
LB: loop body
LE: loop exit
PB: predicated region body
PF: predicated region fallthrough
CT: control target
= control target key end

     0   :  { %12 = vsyncpa [#allocation3], 0  ;;  %s758_s0 = inlined_call_operand.hbm [shape: f32[8,32], index: 0, kind: input, shape index: {}]   ;;  %s759_s1 = inlined_call_operand.hbm [shape: bf16[32,128], index: 1, kind: input, shape index: {}]   ;;  %s760_s2 = inlined_call_operand.vmem [shape: f32[1,128], index: 2, kind: input, shape index: {}]   ;;  %s761_s3 = inlined_call_operand.hbm [shape: bf16[128,128], index: 3, kind: input, shape index: {}]   ;;  %s762_s4 = inlined_call_operand.vmem [shape: f32[1,128], index: 4, kind: input, shape index: {}]   ;;  %s763_s5 = inlined_call_operand.hbm [shape: bf16[128,128], index: 5, kind: input, shape index: {}]   ;;  %s764_s6 = inlined_call_operand.vmem [shape: f32[1,128], index: 6, kind: input, shape index: {}]   ;;  %s765_s7 = inlined_call_operand.vmem [shape: f32[8,128], index: 7, kind: output, shape index: {}]  }
   0x1   :  { %13 = vsyncpa [#allocation5], 0 }
   0x2   :  { %14 = vsyncpa [#allocation8], 0  ;;  %s617_s24 = smov [#allocation4]   ;;  %s523_s28 = scalar_lea.hbm %s759_s1, 256 }
   0x3   :  { %s30_s25 = sshll.u32 %s617_s24, 4  ;;  %p524_p0 = scmp.ne.s32.totalorder %s759_s1, %s523_s28  ;;  %s31_s25 = int_to_ptr.vmem [resolvable:$true] %s30_s25 }
   0x4   :  { %p527_p1 = scmp.lt.u32.totalorder %s523_s28, %s759_s1 }
   0x6   :  { %p529_p2 = pnand %p527_p1, %p524_p0 }
   0x8   :  { %532 = shalt.err (!%p529_p2)
}
   0x9   :  { %s533_s10 = scalar_lea.vmem %s31_s25, 256  ;;  %p538_p4 = scmp.lt.s32.totalorder %s31_s25, %s31_s25 }
   0xa   :  { %p534_p3 = scmp.ne.s32.totalorder %s31_s25, %s533_s10  ;;  %p539_p5 = scmp.lt.s32.totalorder %s533_s10, %s533_s10 }
   0xc   :  { %p540_p6 = por %p539_p5, %p538_p4 }
   0xe   :  { %p541_p7 = pnand %p540_p6, %p534_p3 }
  0x10   :  { %544 = shalt.err (!%p541_p7)
}
  0x11   :  { %s618_s11 = smov 64   ;;  %s619_s12 = smov 4  }
  0x12   :  { %36 = dma.hbm_to_vmem [thread:$0]  %s759_s1, 256, %s31_s25, [#allocation5], %s618_s11, %s618_s11, %s619_s12  }
  0x13   :  { %s620_s15 = smov [#allocation2]   ;;  %s621_s17 = smov [#allocation6]  }
  0x14   :  { %s21_s16 = sshll.u32 %s620_s15, 4  ;;  %s44_s18 = sshll.u32 %s621_s17, 4  ;;  %s22_s16 = int_to_ptr.vmem [resolvable:$true] %s21_s16  ;;  %s45_s18 = int_to_ptr.vmem [resolvable:$true] %s44_s18 }
  0x15   :  { %s545_s21 = scalar_lea.hbm %s758_s0, 128 }
  0x16   :  { %p546_p8 = scmp.ne.s32.totalorder %s758_s0, %s545_s21  ;;  %p549_p9 = scmp.lt.u32.totalorder %s545_s21, %s758_s0 }
  0x18   :  { %p551_p10 = pnand %p549_p9, %p546_p8 }
  0x1a   :  { %554 = shalt.err (!%p551_p10)
}
  0x1b   :  { %s555_s1 = scalar_lea.vmem %s22_s16, 128  ;;  %p560_p12 = scmp.lt.s32.totalorder %s22_s16, %s22_s16 }
  0x1c   :  { %p556_p11 = scmp.ne.s32.totalorder %s22_s16, %s555_s1  ;;  %p561_p13 = scmp.lt.s32.totalorder %s555_s1, %s555_s1 }
  0x1e   :  { %p562_p0 = por %p561_p13, %p560_p12 }
  0x20   :  { %p563_p1 = pnand %p562_p0, %p556_p11 }
  0x22   :  { %566 = shalt.err (!%p563_p1)
}
  0x23   :  { %24 = dma.hbm_to_vmem [thread:$0]  %s758_s0, 128, %s22_s16, [#allocation3]  }
  0x24   :  { %s567_s30 = scalar_lea.hbm %s761_s3, 1024 }
  0x25   :  { %p568_p2 = scmp.ne.s32.totalorder %s761_s3, %s567_s30  ;;  %p571_p3 = scmp.lt.u32.totalorder %s567_s30, %s761_s3 }
  0x27   :  { %p573_p4 = pnand %p571_p3, %p568_p2 }
  0x29   :  { %576 = shalt.err (!%p573_p4)
}
  0x2a   :  { %s577_s14 = scalar_lea.vmem %s45_s18, 1024  ;;  %p582_p6 = scmp.lt.s32.totalorder %s45_s18, %s45_s18 }
  0x2b   :  { %p578_p5 = scmp.ne.s32.totalorder %s45_s18, %s577_s14  ;;  %p583_p7 = scmp.lt.s32.totalorder %s577_s14, %s577_s14 }
  0x2d   :  { %p584_p8 = por %p583_p7, %p582_p6 }
  0x2f   :  { %p585_p9 = pnand %p584_p8, %p578_p5 }
  0x31   :  { %588 = shalt.err (!%p585_p9)
}
  0x32   :  { %50 = dma.hbm_to_vmem [thread:$0]  %s761_s3, 1024, %s45_s18, [#allocation5], %s618_s11, %s618_s11, %s619_s12  }
  0x33   :  { %s622_s16 = smov [#allocation7]   ;;  %s589_s21 = scalar_lea.hbm %s763_s5, 1024 }
  0x34   :  { %s58_s17 = sshll.u32 %s622_s16, 4  ;;  %p590_p10 = scmp.ne.s32.totalorder %s763_s5, %s589_s21  ;;  %s59_s17 = int_to_ptr.vmem [resolvable:$true] %s58_s17 }
  0x35   :  { %p593_p11 = scmp.lt.u32.totalorder %s589_s21, %s763_s5 }
  0x37   :  { %p595_p12 = pnand %p593_p11, %p590_p10 }
  0x39   :  { %598 = shalt.err (!%p595_p12)
}
  0x3a   :  { %s599_s1 = scalar_lea.vmem %s59_s17, 1024  ;;  %p604_p0 = scmp.lt.s32.totalorder %s59_s17, %s59_s17 }
  0x3b   :  { %p600_p13 = scmp.ne.s32.totalorder %s59_s17, %s599_s1  ;;  %p605_p1 = scmp.lt.s32.totalorder %s599_s1, %s599_s1 }
  0x3d   :  { %p606_p2 = por %p605_p1, %p604_p0 }
  0x3f   :  { %p607_p3 = pnand %p606_p2, %p600_p13 }
  0x41   :  { %610 = shalt.err (!%p607_p3)
}
  0x42   :  { %64 = dma.hbm_to_vmem [thread:$0]  %s763_s5, 1024, %s59_s17, [#allocation8], %s618_s11, %s618_s11, %s619_s12  }
  0x43   :  { %611 = dma.done.wait [#allocation3], 128  }
  0x44   :  { %612 = vsyncadd [#allocation3], 4294967168 }
  0x45   :  { %613 = dma.done.wait [#allocation5], 1280  }
  0x46   :  { %614 = vsyncadd [#allocation5], 4294966016 }
  0x47   :  { %615 = dma.done.wait [#allocation8], 1024  }
  0x48   :  { %616 = vsyncadd [#allocation8], 4294966272  ;;  %v623_v0 = vmov 0.0   ;;  %vm624_vm0 = vmmov 0   ;;  %v501_v1 = vld [vmem:[#allocation4] sm:$0xff]   ;;  %v502_v2 = vld [vmem:[#allocation4 + $0x8] sm:$0xff]   ;;  %v376_v49 = vlaneseq }
  0x49   :  { %445 = vmatprep.subr.bf16.mxu0 %v623_v0  ;;  %449 = vmatprep.mubr.msk.bf16.mxu0 %vm624_vm0, %v623_v0  ;;  %v80_v3 = vld [vmem:[#allocation2] sm:$0xff]  ;;  %v503_v4 = vld [vmem:[#allocation6] sm:$0xff]   ;;  %vm105_vm1 = vcmask 261120   ;;  %v505_v7 = vld [vmem:[#allocation6 + $0x10] sm:$0xff]  }
  0x4a   :  { %453 = vmatprep.subr.bf16.mxu1 %v623_v0  ;;  %469 = vmatprep.mubr.msk.bf16.mxu1 %vm624_vm0, %v623_v0  ;;  %v81_v5 = vpack.c.bf16 %v80_v3, %v80_v3  ;;  %v504_v6 = vld [vmem:[#allocation6 + $0x8] sm:$0xff]   ;;  %v506_v8 = vld [vmem:[#allocation6 + $0x18] sm:$0xff]   ;;  %v507_v9 = vld [vmem:[#allocation6 + $0x20] sm:$0xff]   ;;  %v377_v53 = vand.u32 127, %v376_v49 }
  0x4b   :  { %446 = vmatpush3.bf16.msra.mxu0 %v501_v1  ;;  %454 = vmatpush3.bf16.msra.mxu1 %v503_v4  ;;  %v508_v10 = vld [vmem:[#allocation6 + $0x28] sm:$0xff]   ;;  %v509_v11 = vld [vmem:[#allocation6 + $0x30] sm:$0xff]   ;;  %v510_v12 = vld [vmem:[#allocation6 + $0x38] sm:$0xff]  }
  0x4c   :  { %447 = vmatprep.subr.bf16.mxu0 %v623_v0  ;;  %455 = vmatprep.subr.bf16.mxu1 %v623_v0  ;;  %v511_v13 = vld [vmem:[#allocation7] sm:$0xff]   ;;  %v512_v14 = vld [vmem:[#allocation7 + $0x8] sm:$0xff]   ;;  %v513_v15 = vld [vmem:[#allocation7 + $0x10] sm:$0xff]   ;;  %vm391_vm3 = vcmp.lt.s32.totalorder %v377_v53, 64 }
  0x4d   :  { %v514_v16 = vld [vmem:[#allocation7 + $0x18] sm:$0xff]   ;;  %v515_v17 = vld [vmem:[#allocation7 + $0x20] sm:$0xff]   ;;  %v516_v18 = vld [vmem:[#allocation7 + $0x28] sm:$0xff]  }
  0x4e   :  { %v402_v19 = vld [vmem:[%s760_s2] ss:$0 sm:$0xff]  ;;  %v517_v27 = vld [vmem:[#allocation7 + $0x30] sm:$0xff]   ;;  %v518_v28 = vld [vmem:[#allocation7 + $0x38] sm:$0xff]  }
  0x4f   :  { %448 = vmatpush3.bf16.msra.mxu0 %v502_v2  ;;  %456 = vmatpush3.bf16.msra.mxu1 %v504_v6  ;;  %v406_v29 = vld [vmem:[%s762_s4] ss:$0 sm:$0xff] }
  0x50   :  { %473 = vmatprep.subr.bf16.mxu0 %v623_v0  ;;  %457 = vmatprep.subr.bf16.mxu1 %v623_v0  ;;  %v415_v37 = vld [vmem:[%s764_s6] ss:$0 sm:$0xff] }
  0x52   :  { %450 = vmatmul.mubr.msk.bf16.vlgmr.msra.gmra.mrb[0].mxu0 %vm105_vm1, %v81_v5 }
  0x53   :  { %489 = vmatprep.mubr.msk.bf16.mxu0 %vm624_vm0, %v623_v0  ;;  %458 = vmatpush3.bf16.msra.mxu1 %v505_v7 }
  0x54   :  { %459 = vmatprep.subr.bf16.mxu1 %v623_v0  ;;  %474 = vmatpush3.bf16.msra.mxu0 %v511_v13 }
  0x55   :  { %475 = vmatprep.subr.bf16.mxu0 %v623_v0 }
  0x57   :  { %460 = vmatpush3.bf16.msra.mxu1 %v506_v8 }
  0x58   :  { %461 = vmatprep.subr.bf16.mxu1 %v623_v0  ;;  %476 = vmatpush3.bf16.msra.mxu0 %v512_v14 }
  0x59   :  { %477 = vmatprep.subr.bf16.mxu0 %v623_v0 }
  0x5b   :  { %462 = vmatpush3.bf16.msra.mxu1 %v507_v9 }
  0x5c   :  { %463 = vmatprep.subr.bf16.mxu1 %v623_v0  ;;  %478 = vmatpush3.bf16.msra.mxu0 %v513_v15 }
  0x5d   :  { %479 = vmatprep.subr.bf16.mxu0 %v623_v0 }
  0x5f   :  { %464 = vmatpush3.bf16.msra.mxu1 %v508_v10 }
  0x60   :  { %465 = vmatprep.subr.bf16.mxu1 %v623_v0  ;;  %480 = vmatpush3.bf16.msra.mxu0 %v514_v16 }
  0x61   :  { %481 = vmatprep.subr.bf16.mxu0 %v623_v0 }
  0x63   :  { %466 = vmatpush3.bf16.msra.mxu1 %v509_v11 }
  0x64   :  { %467 = vmatprep.subr.bf16.mxu1 %v623_v0  ;;  %482 = vmatpush3.bf16.msra.mxu0 %v515_v17 }
  0x65   :  { %483 = vmatprep.subr.bf16.mxu0 %v623_v0 }
  0x67   :  { %468 = vmatpush3.bf16.msra.mxu1 %v510_v12 }
  0x68   :  { %484 = vmatpush3.bf16.msra.mxu0 %v516_v18 }
  0x69   :  { %485 = vmatprep.subr.bf16.mxu0 %v623_v0 }
  0x6c   :  { %486 = vmatpush3.bf16.msra.mxu0 %v517_v27 }
  0x6d   :  { %487 = vmatprep.subr.bf16.mxu0 %v623_v0 }
  0x70   :  { %488 = vmatpush3.bf16.msra.mxu0 %v518_v28 }
 0x125   :  { %v143_v20 = vpop.f32.mrb[0].mxu0 }
 0x126   :  { %v144_v21 = vadd.f32 %v402_v19, %v143_v20  ;;  %v451_v22 = vpop.f32.mrb[1].mxu0 }
 0x127   :  { %v146_v23 = vpop.f32.mrb[2].mxu0 }
 0x128   :  { %v149_v24 = vmax.f32 %v144_v21, 0.0  ;;  %v452_v25 = vpop.f32.mrb[3].mxu0 }
 0x12a   :  { %v150_v26 = vpack.c.bf16 %v149_v24, %v149_v24 }
 0x12c   :  { %470 = vmatmul.mubr.bf16.vlgmr.msra.gmra.mrb[0].mxu1 %v150_v26 }
 0x1ff   :  { %v256_v30 = vpop.f32.mrb[0].mxu1 }
 0x200   :  { %v257_v31 = vadd.f32 %v406_v29, %v256_v30  ;;  %v471_v32 = vpop.f32.mrb[1].mxu1 }
 0x201   :  { %v259_v33 = vpop.f32.mrb[2].mxu1 }
 0x202   :  { %v262_v34 = vmax.f32 %v257_v31, 0.0  ;;  %v472_v35 = vpop.f32.mrb[3].mxu1 }
 0x204   :  { %v263_v36 = vpack.c.bf16 %v262_v34, %v262_v34 }
 0x206   :  { %490 = vmatmul.mubr.bf16.vlgmr.msra.gmra.mrb[4].mxu0 %v263_v36 }
 0x2d9   :  { %v369_v38 = vpop.f32.mrb[4].mxu0 }
 0x2da   :  { %v370_v39 = vadd.f32 %v415_v37, %v369_v38  ;;  %v491_v40 = vpop.f32.mrb[5].mxu0 }
 0x2db   :  { %v372_v41 = vpop.f32.mrb[6].mxu0 }
 0x2dc   :  { %v375_v42 = vmax.f32 %v370_v39, 0.0  ;;  %v492_v43 = vpop.f32.mrb[7].mxu0 }
 0x2de   :  { %v378_v44 = vsub.f32 0.0, %v375_v42 }
 0x2e0   :  { %v379_v45 = vmul.f32 1.442695, %v378_v44 }
 0x2e2   :  { %519 = vpow2.f32 %v379_v45 }
 0x2ec   :  { %v520_v46 = vpop.eup %519 }
 0x2ed   :  { %v381_v47 = vadd.f32 1.0, %v520_v46  ;;  %v384_v48 = vmul.f32 -0.5, %v520_v46  ;;  %v387_v51 = vand.u32 2147483647, %v520_v46 }
 0x2ef   :  { %521 = vlog2.f32 %v381_v47  ;;  %v385_v50 = vadd.f32 1.0, %v384_v48  ;;  %vm388_vm2 = vcmp.lt.f32.partialorder %v387_v51, 0.0004427343 }
 0x2f1   :  { %v386_v55 = vmul.f32 %v520_v46, %v385_v50 }
 0x2f9   :  { %v522_v52 = vpop.eup %521 }
 0x2fa   :  { %v383_v54 = vmul.f32 0.6931472, %v522_v52 }
 0x2fc   :  { %v389_v56 = vsel %vm388_vm2, %v386_v55, %v383_v54 }
 0x2fd   :  { %v390_v57 = vadd.f32 %v389_v56, %v375_v42 }
 0x2ff   :  { %v392_v58 = vadd.f32 1e-06, %v390_v57 }
 0x301   :  { %v393_v59 = vsel %vm391_vm3, %v375_v42, %v392_v58 }
 0x302   :  { %394 = vst [vmem:[%s765_s7] sm:$0xff] %v393_v59 }
 0x303   :  { %399 = vsyncpa [#allocation3], 1 }
 0x304   :  { %400 = vsyncpa [#allocation5], 1 }
 0x305   :  { %401 = vsyncpa [#allocation8], 1 }

</bundles_post_ra>
